<compile_context>
chip_gen: v5e
topology: v5e:2x2
jax: 0.10.0
libtpu: 0.0.40
codegen_flags: <defaults>
</compile_context>

<pallas_src>
import jax
import jax.numpy as jnp
from jax.experimental import pallas as pl
from jax.experimental.pallas import tpu as pltpu


def _pack_gru_params(w_ih, w_hh, b_ih, b_hh, H, HP):
    """Pack PyTorch-layout GRU params into kernel-friendly, lane-aligned form.

    w_ih: (D, 3H, E), w_hh: (D, 3H, H), b_ih/b_hh: (D, 3H)  (gate order r,z,n)
    Returns:
      W_ih_packed: (E, D*3*HP)        gi = x @ W_ih_packed
      W_hh_packed: (D*H, D*3*HP)      gh = h_flat @ W_hh_packed  (block-diag)
      biases:      (2, D*3*HP)        row 0 = b_ih, row 1 = b_hh
    Gate g of direction d lives in columns [d*3*HP + g*HP, d*3*HP + g*HP + H).
    """
    D = w_ih.shape[0]
    E = w_ih.shape[2]
    G = D * 3 * HP
    W_ih = jnp.zeros((E, G), jnp.float32)
    W_hh = jnp.zeros((D * H, G), jnp.float32)
    b = jnp.zeros((2, G), jnp.float32)
    for d in range(D):
        for g in range(3):
            col = d * 3 * HP + g * HP
            W_ih = W_ih.at[:, col:col + H].set(w_ih[d, g * H:(g + 1) * H, :].T)
            W_hh = W_hh.at[d * H:(d + 1) * H, col:col + H].set(
                w_hh[d, g * H:(g + 1) * H, :].T)
            b = b.at[0, col:col + H].set(b_ih[d, g * H:(g + 1) * H])
            b = b.at[1, col:col + H].set(b_hh[d, g * H:(g + 1) * H])
    return W_ih, W_hh, b


def make_encoder_step(H, D, HP):
    """Build the single-invocation Pallas kernel for one encoder timestep."""

    def kernel(tok_ref, emb_ref, h_ref, w_ih_ref, w_hh_ref, b_ref,
               out_ref, h_new_ref):
        tok = tok_ref[0]                        # SMEM scalar token id
        x = emb_ref[tok]                        # (1, E) fused embedding gather

        h0 = h_ref[0]                           # (1, H)
        if D == 2:
            h1 = h_ref[1]                       # (1, H)
            h_flat = jnp.concatenate([h0, h1], axis=-1)   # (1, D*H)
        else:
            h1 = None
            h_flat = h0

        # Two merged matmuls cover all gates of all directions.
        gi = jnp.dot(x, w_ih_ref[...],
                     preferred_element_type=jnp.float32) + b_ref[0:1, :]
        gh = jnp.dot(h_flat, w_hh_ref[...],
                     preferred_element_type=jnp.float32) + b_ref[1:2, :]

        outs = []
        for d in range(D):                      # static unroll (D <= 2)
            base = d * 3 * HP                   # lane-aligned gate offsets
            r = jax.nn.sigmoid(gi[:, base:base + HP] +
                               gh[:, base:base + HP])
            z = jax.nn.sigmoid(gi[:, base + HP:base + 2 * HP] +
                               gh[:, base + HP:base + 2 * HP])
            n = jnp.tanh(gi[:, base + 2 * HP:base + 3 * HP] +
                         r * gh[:, base + 2 * HP:base + 3 * HP])
            h_d = h0 if d == 0 else h1
            h_new_d = ((1.0 - z[:, :H]) * n[:, :H] +
                       z[:, :H] * h_d).astype(h_new_ref.dtype)
            h_new_ref[d] = h_new_d
            outs.append(h_new_d)

        # concat of the per-direction new states IS the GRU output (seq=1)
        out_ref[0] = (jnp.concatenate(outs, axis=-1) if D == 2
                      else outs[0]).astype(out_ref.dtype)

    step = pl.pallas_call(
        kernel,
        out_shape=(
            jax.ShapeDtypeStruct((1, 1, D * H), jnp.float32),   # output
            jax.ShapeDtypeStruct((D, 1, H), jnp.float32),       # hidden_new
        ),
        in_specs=[
            pl.BlockSpec(memory_space=pltpu.MemorySpace.SMEM),  # token id
            pl.BlockSpec(memory_space=pltpu.MemorySpace.VMEM),  # emb table
            pl.BlockSpec(memory_space=pltpu.MemorySpace.VMEM),  # hidden
            pl.BlockSpec(memory_space=pltpu.MemorySpace.VMEM),  # W_ih packed
            pl.BlockSpec(memory_space=pltpu.MemorySpace.VMEM),  # W_hh packed
            pl.BlockSpec(memory_space=pltpu.MemorySpace.VMEM),  # biases
        ],
        out_specs=(
            pl.BlockSpec(memory_space=pltpu.MemorySpace.VMEM),
            pl.BlockSpec(memory_space=pltpu.MemorySpace.VMEM),
        ),
    )
    return jax.jit(step)


class EncoderRNNPallas:
    """JAX/Pallas equivalent of EncoderRNN.forward (use_pretrained path)."""

    def __init__(self, vocab_size, emb_dim, hidden_size, key,
                 bidirectional=True):
        self.hidden_size = hidden_size
        self.num_directions = 2 if bidirectional else 1
        D, H, E = self.num_directions, hidden_size, emb_dim
        self.HP = ((H + 127) // 128) * 128      # lane-aligned per-gate width

        ks = jax.random.split(key, 6)
        scale = 1.0 / jnp.sqrt(H)
        # deterministic synthetic "pretrained" embedding matrix
        self.emb_weight = jax.random.normal(ks[0], (vocab_size, E),
                                            dtype=jnp.float32)
        # PyTorch-layout GRU parameters (gate order r, z, n)
        self.w_ih = jax.random.uniform(ks[1], (D, 3 * H, E), jnp.float32,
                                       -scale, scale)
        self.w_hh = jax.random.uniform(ks[2], (D, 3 * H, H), jnp.float32,
                                       -scale, scale)
        self.b_ih = jax.random.uniform(ks[3], (D, 3 * H), jnp.float32,
                                       -scale, scale)
        self.b_hh = jax.random.uniform(ks[4], (D, 3 * H), jnp.float32,
                                       -scale, scale)

        # --- one-time packing for the kernel (no per-forward re-layout) ---
        self.emb3 = self.emb_weight[:, None, :]                 # (V, 1, E)
        (self.W_ih_packed, self.W_hh_packed,
         self.biases_packed) = _pack_gru_params(self.w_ih, self.w_hh,
                                                self.b_ih, self.b_hh,
                                                H, self.HP)
        self._step = make_encoder_step(H, D, self.HP)

    def initHidden(self):
        return jnp.zeros((self.num_directions, 1, self.hidden_size),
                         dtype=jnp.float32)

    def forward(self, token, hidden):
        tok = jnp.asarray(token, jnp.int32).reshape(1)
        output, hidden_new = self._step(tok, self.emb3, hidden,
                                        self.W_ih_packed, self.W_hh_packed,
                                        self.biases_packed)
        return output, hidden_new


def gru_step_reference(x, hidden, w_ih, w_hh, b_ih, b_hh):
    """Pure-JAX reference matching torch.nn.GRU (seq=1, batch=1)."""
    D, _, H = hidden.shape
    outs, hs = [], []
    for d in range(D):
        xv = x[0]          # (1, E)
        h = hidden[d]      # (1, H)
        gi = xv @ w_ih[d].T + b_ih[d]
        gh = h @ w_hh[d].T + b_hh[d]
        r = jax.nn.sigmoid(gi[:, 0:H] + gh[:, 0:H])
        z = jax.nn.sigmoid(gi[:, H:2 * H] + gh[:, H:2 * H])
        n = jnp.tanh(gi[:, 2 * H:] + r * gh[:, 2 * H:])
        hn = (1.0 - z) * n + z * h
        hs.append(hn)
        outs.append(hn)
    output = jnp.concatenate(outs, axis=-1)[None]
    return output, jnp.stack(hs, axis=0)


if __name__ == "__main__":
    VOCAB, EMB_DIM, HIDDEN = 20, 50, 32

    enc = EncoderRNNPallas(VOCAB, EMB_DIM, HIDDEN, jax.random.PRNGKey(0),
                           bidirectional=True)

    tokens = jnp.array([3, 7, 1, 15, 0], dtype=jnp.int32)
    hidden = enc.initHidden()
    hidden_ref = hidden

    for t in range(int(tokens.shape[0])):
        out, hidden = enc.forward(tokens[t], hidden)
        out = jax.block_until_ready(out)
        hidden = jax.block_until_ready(hidden)

        embedded = enc.emb_weight[tokens[t]].reshape(1, 1, -1)
        out_ref, hidden_ref = gru_step_reference(embedded, hidden_ref,
                                                 enc.w_ih, enc.w_hh,
                                                 enc.b_ih, enc.b_hh)
        assert out.shape == (1, 1, 2 * HIDDEN)
        assert hidden.shape == (2, 1, HIDDEN)
        assert jnp.allclose(out, out_ref, atol=1e-4, rtol=1e-4)
        assert jnp.allclose(hidden, hidden_ref, atol=1e-4, rtol=1e-4)

    print("KERNEL_OK")
</pallas_src>

<mosaic_0001>
module attributes {stable_mosaic.version = 11 : i64} {
  func.func @kernel(%arg0: memref<1xi32, #tpu.memory_space<smem>>, %arg1: memref<20x1x50xf32, #tpu.memory_space<vmem>>, %arg2: memref<2x1x32xf32, #tpu.memory_space<vmem>>, %arg3: memref<50x768xf32, #tpu.memory_space<vmem>>, %arg4: memref<64x768xf32, #tpu.memory_space<vmem>>, %arg5: memref<2x768xf32, #tpu.memory_space<vmem>>, %arg6: memref<1x1x64xf32, #tpu.memory_space<vmem>>, %arg7: memref<2x1x32xf32, #tpu.memory_space<vmem>>) attributes {dimension_semantics = [], scalar_prefetch = 0 : i64, scratch_operands = 0 : i64, tpu.core_type = #tpu.core_type<tc>} {
    %c0 = arith.constant 0 : index
    %0 = memref.load %arg0[%c0] : memref<1xi32, #tpu.memory_space<smem>>
    %1 = arith.index_cast %0 : i32 to index
    %c0_0 = arith.constant 0 : index
    %c0_1 = arith.constant 0 : index
    %2 = vector.load %arg1[%1, %c0_0, %c0_1] : memref<20x1x50xf32, #tpu.memory_space<vmem>>, vector<1x1x50xf32>
    %3 = vector.shape_cast %2 : vector<1x1x50xf32> to vector<1x50xf32>
    %c0_2 = arith.constant 0 : index
    %c0_3 = arith.constant 0 : index
    %c0_4 = arith.constant 0 : index
    %4 = vector.load %arg2[%c0_2, %c0_3, %c0_4] : memref<2x1x32xf32, #tpu.memory_space<vmem>>, vector<1x1x32xf32>
    %5 = vector.shape_cast %4 : vector<1x1x32xf32> to vector<1x32xf32>
    %c1 = arith.constant 1 : index
    %c0_5 = arith.constant 0 : index
    %c0_6 = arith.constant 0 : index
    %6 = vector.load %arg2[%c1, %c0_5, %c0_6] : memref<2x1x32xf32, #tpu.memory_space<vmem>>, vector<1x1x32xf32>
    %7 = vector.shape_cast %6 : vector<1x1x32xf32> to vector<1x32xf32>
    %8 = tpu.concatenate %5, %7 in 1 : vector<1x32xf32>, vector<1x32xf32> -> vector<1x64xf32>
    %c0_7 = arith.constant 0 : index
    %c0_8 = arith.constant 0 : index
    %9 = vector.load %arg3[%c0_7, %c0_8] : memref<50x768xf32, #tpu.memory_space<vmem>>, vector<50x768xf32>
    %cst = arith.constant dense<0.000000e+00> : vector<1x768xf32>
    %10 = tpu.matmul %3, %9, %cst {dimension_numbers = #tpu.dot_dimension_numbers<[1], [0], [0], [1], [0, 0, 1, 1], [], []>} : vector<1x50xf32>, vector<50x768xf32>, vector<1x768xf32> -> vector<1x768xf32>
    %c0_9 = arith.constant 0 : index
    %c0_10 = arith.constant 0 : index
    %11 = vector.load %arg5[%c0_9, %c0_10] : memref<2x768xf32, #tpu.memory_space<vmem>>, vector<1x768xf32>
    %12 = arith.addf %10, %11 : vector<1x768xf32>
    %c0_11 = arith.constant 0 : index
    %c0_12 = arith.constant 0 : index
    %13 = vector.load %arg4[%c0_11, %c0_12] : memref<64x768xf32, #tpu.memory_space<vmem>>, vector<64x768xf32>
    %cst_13 = arith.constant dense<0.000000e+00> : vector<1x768xf32>
    %14 = tpu.matmul %8, %13, %cst_13 {dimension_numbers = #tpu.dot_dimension_numbers<[1], [0], [0], [1], [0, 0, 1, 1], [], []>} : vector<1x64xf32>, vector<64x768xf32>, vector<1x768xf32> -> vector<1x768xf32>
    %c1_14 = arith.constant 1 : index
    %c0_15 = arith.constant 0 : index
    %15 = vector.load %arg5[%c1_14, %c0_15] : memref<2x768xf32, #tpu.memory_space<vmem>>, vector<1x768xf32>
    %16 = arith.addf %14, %15 : vector<1x768xf32>
    %17 = vector.extract_strided_slice %12 {offsets = [0, 0], sizes = [1, 128], strides = [1, 1]} : vector<1x768xf32> to vector<1x128xf32>
    %18 = vector.extract_strided_slice %16 {offsets = [0, 0], sizes = [1, 128], strides = [1, 1]} : vector<1x768xf32> to vector<1x128xf32>
    %19 = arith.addf %17, %18 : vector<1x128xf32>
    %20 = arith.negf %19 : vector<1x128xf32>
    %21 = math.exp %20 : vector<1x128xf32>
    %cst_16 = arith.constant 1.000000e+00 : f32
    %22 = vector.broadcast %cst_16 : f32 to vector<1x128xf32>
    %23 = arith.addf %22, %21 : vector<1x128xf32>
    %24 = arith.divf %22, %23 : vector<1x128xf32>
    %25 = vector.extract_strided_slice %12 {offsets = [0, 128], sizes = [1, 128], strides = [1, 1]} : vector<1x768xf32> to vector<1x128xf32>
    %26 = vector.extract_strided_slice %16 {offsets = [0, 128], sizes = [1, 128], strides = [1, 1]} : vector<1x768xf32> to vector<1x128xf32>
    %27 = arith.addf %25, %26 : vector<1x128xf32>
    %28 = arith.negf %27 : vector<1x128xf32>
    %29 = math.exp %28 : vector<1x128xf32>
    %cst_17 = arith.constant 1.000000e+00 : f32
    %30 = vector.broadcast %cst_17 : f32 to vector<1x128xf32>
    %31 = arith.addf %30, %29 : vector<1x128xf32>
    %32 = arith.divf %30, %31 : vector<1x128xf32>
    %33 = vector.extract_strided_slice %12 {offsets = [0, 256], sizes = [1, 128], strides = [1, 1]} : vector<1x768xf32> to vector<1x128xf32>
    %34 = vector.extract_strided_slice %16 {offsets = [0, 256], sizes = [1, 128], strides = [1, 1]} : vector<1x768xf32> to vector<1x128xf32>
    %35 = arith.mulf %24, %34 : vector<1x128xf32>
    %36 = arith.addf %33, %35 : vector<1x128xf32>
    %37 = math.tanh %36 : vector<1x128xf32>
    %38 = vector.extract_strided_slice %32 {offsets = [0, 0], sizes = [1, 32], strides = [1, 1]} : vector<1x128xf32> to vector<1x32xf32>
    %cst_18 = arith.constant 1.000000e+00 : f32
    %39 = vector.broadcast %cst_18 : f32 to vector<1x32xf32>
    %40 = arith.subf %39, %38 : vector<1x32xf32>
    %41 = vector.extract_strided_slice %37 {offsets = [0, 0], sizes = [1, 32], strides = [1, 1]} : vector<1x128xf32> to vector<1x32xf32>
    %42 = arith.mulf %40, %41 : vector<1x32xf32>
    %43 = vector.extract_strided_slice %32 {offsets = [0, 0], sizes = [1, 32], strides = [1, 1]} : vector<1x128xf32> to vector<1x32xf32>
    %44 = arith.mulf %43, %5 : vector<1x32xf32>
    %45 = arith.addf %42, %44 : vector<1x32xf32>
    %c0_19 = arith.constant 0 : index
    %c0_20 = arith.constant 0 : index
    %c0_21 = arith.constant 0 : index
    %46 = vector.load %arg7[%c0_19, %c0_20, %c0_21] : memref<2x1x32xf32, #tpu.memory_space<vmem>>, vector<1x1x32xf32>
    %47 = vector.shape_cast %46 : vector<1x1x32xf32> to vector<1x32xf32>
    %48 = vector.shape_cast %45 : vector<1x32xf32> to vector<1x1x32xf32>
    tpu.vector_store %arg7[%c0_19, %c0_20, %c0_21], %48 {strides = array<i32>} : memref<2x1x32xf32, #tpu.memory_space<vmem>>, vector<1x1x32xf32>,
    %49 = vector.extract_strided_slice %12 {offsets = [0, 384], sizes = [1, 128], strides = [1, 1]} : vector<1x768xf32> to vector<1x128xf32>
    %50 = vector.extract_strided_slice %16 {offsets = [0, 384], sizes = [1, 128], strides = [1, 1]} : vector<1x768xf32> to vector<1x128xf32>
    %51 = arith.addf %49, %50 : vector<1x128xf32>
    %52 = arith.negf %51 : vector<1x128xf32>
    %53 = math.exp %52 : vector<1x128xf32>
    %cst_22 = arith.constant 1.000000e+00 : f32
    %54 = vector.broadcast %cst_22 : f32 to vector<1x128xf32>
    %55 = arith.addf %54, %53 : vector<1x128xf32>
    %56 = arith.divf %54, %55 : vector<1x128xf32>
    %57 = vector.extract_strided_slice %12 {offsets = [0, 512], sizes = [1, 128], strides = [1, 1]} : vector<1x768xf32> to vector<1x128xf32>
    %58 = vector.extract_strided_slice %16 {offsets = [0, 512], sizes = [1, 128], strides = [1, 1]} : vector<1x768xf32> to vector<1x128xf32>
    %59 = arith.addf %57, %58 : vector<1x128xf32>
    %60 = arith.negf %59 : vector<1x128xf32>
    %61 = math.exp %60 : vector<1x128xf32>
    %cst_23 = arith.constant 1.000000e+00 : f32
    %62 = vector.broadcast %cst_23 : f32 to vector<1x128xf32>
    %63 = arith.addf %62, %61 : vector<1x128xf32>
    %64 = arith.divf %62, %63 : vector<1x128xf32>
    %65 = vector.extract_strided_slice %12 {offsets = [0, 640], sizes = [1, 128], strides = [1, 1]} : vector<1x768xf32> to vector<1x128xf32>
    %66 = vector.extract_strided_slice %16 {offsets = [0, 640], sizes = [1, 128], strides = [1, 1]} : vector<1x768xf32> to vector<1x128xf32>
    %67 = arith.mulf %56, %66 : vector<1x128xf32>
    %68 = arith.addf %65, %67 : vector<1x128xf32>
    %69 = math.tanh %68 : vector<1x128xf32>
    %70 = vector.extract_strided_slice %64 {offsets = [0, 0], sizes = [1, 32], strides = [1, 1]} : vector<1x128xf32> to vector<1x32xf32>
    %cst_24 = arith.constant 1.000000e+00 : f32
    %71 = vector.broadcast %cst_24 : f32 to vector<1x32xf32>
    %72 = arith.subf %71, %70 : vector<1x32xf32>
    %73 = vector.extract_strided_slice %69 {offsets = [0, 0], sizes = [1, 32], strides = [1, 1]} : vector<1x128xf32> to vector<1x32xf32>
    %74 = arith.mulf %72, %73 : vector<1x32xf32>
    %75 = vector.extract_strided_slice %64 {offsets = [0, 0], sizes = [1, 32], strides = [1, 1]} : vector<1x128xf32> to vector<1x32xf32>
    %76 = arith.mulf %75, %7 : vector<1x32xf32>
    %77 = arith.addf %74, %76 : vector<1x32xf32>
    %c1_25 = arith.constant 1 : index
    %c0_26 = arith.constant 0 : index
    %c0_27 = arith.constant 0 : index
    %78 = vector.load %arg7[%c1_25, %c0_26, %c0_27] : memref<2x1x32xf32, #tpu.memory_space<vmem>>, vector<1x1x32xf32>
    %79 = vector.shape_cast %78 : vector<1x1x32xf32> to vector<1x32xf32>
    %80 = vector.shape_cast %77 : vector<1x32xf32> to vector<1x1x32xf32>
    tpu.vector_store %arg7[%c1_25, %c0_26, %c0_27], %80 {strides = array<i32>} : memref<2x1x32xf32, #tpu.memory_space<vmem>>, vector<1x1x32xf32>,
    %81 = tpu.concatenate %45, %77 in 1 : vector<1x32xf32>, vector<1x32xf32> -> vector<1x64xf32>
    %c0_28 = arith.constant 0 : index
    %c0_29 = arith.constant 0 : index
    %c0_30 = arith.constant 0 : index
    %82 = vector.load %arg6[%c0_28, %c0_29, %c0_30] : memref<1x1x64xf32, #tpu.memory_space<vmem>>, vector<1x1x64xf32>
    %83 = vector.shape_cast %82 : vector<1x1x64xf32> to vector<1x64xf32>
    %84 = vector.shape_cast %81 : vector<1x64xf32> to vector<1x1x64xf32>
    tpu.vector_store %arg6[%c0_28, %c0_29, %c0_30], %84 {strides = array<i32>} : memref<1x1x64xf32, #tpu.memory_space<vmem>>, vector<1x1x64xf32>,
    return
  }
}

</mosaic_0001>

<bundles_post_ra>
// kernel: tpu_custom_call.1
= control target key start
LH: loop header
LB: loop body
LE: loop exit
PB: predicated region body
PF: predicated region fallthrough
CT: control target
= control target key end

     0   :  { %14 = vsyncpa [#allocation4], 0  ;;  %s990_s0 = inlined_call_operand.<no memory space> [shape: s32[1], index: 0, kind: input, shape index: {}]   ;;  %s991_s1 = inlined_call_operand.hbm [shape: f32[20,1,50], index: 1, kind: input, shape index: {}]   ;;  %s992_s2 = inlined_call_operand.vmem [shape: f32[2,1,32], index: 2, kind: input, shape index: {}]   ;;  %s993_s3 = inlined_call_operand.hbm [shape: f32[50,768], index: 3, kind: input, shape index: {}]   ;;  %s994_s4 = inlined_call_operand.hbm [shape: f32[64,768], index: 4, kind: input, shape index: {}]   ;;  %s995_s5 = inlined_call_operand.hbm [shape: f32[2,768], index: 5, kind: input, shape index: {}]   ;;  %s996_s6 = inlined_call_operand.hbm [shape: f32[1,1,64], index: 6, kind: output, shape index: {0}]   ;;  %s997_s7 = inlined_call_operand.hbm [shape: f32[2,1,32], index: 7, kind: output, shape index: {1}]  }
   0x1   :  { %15 = vsyncpa [#allocation7], 0 }
   0x2   :  { %16 = vsyncpa [#allocation10], 0 }
   0x3   :  { %17 = vsyncpa [#allocation5], 0  ;;  %s40_s26 = sshll.u32 %s993_s3, 4  ;;  %s41_s26 = int_to_ptr.hbm [resolvable:$true] %s40_s26 }
   0x4   :  { %18 = vsyncpa [#allocation13], 0  ;;  %s840_s27 = smov [#allocation6]   ;;  %s25_s8 = sshll.u32 %s991_s1, 4  ;;  %s26_s8 = int_to_ptr.hbm [resolvable:$true] %s25_s8 }
   0x5   :  { %s42_s28 = sshll.u32 %s840_s27, 4  ;;  %s841_s9 = smov 768   ;;  %s43_s28 = int_to_ptr.vmem [resolvable:$true] %s42_s28 }
   0x6   :  { %s842_s10 = smov 48   ;;  %s843_s11 = smov [#allocation3]  }
   0x7   :  { %48 = dma.hbm_to_vmem [thread:$0]  %s41_s26, 5376, %s43_s28, [#allocation7], %s841_s9, %s841_s9, %s842_s10  }
   0x8   :  { %s27_s12 = sshll.u32 %s843_s11, 4  ;;  %s844_s13 = smov 16   ;;  %s28_s12 = int_to_ptr.vmem [resolvable:$true] %s27_s12 }
   0x9   :  { %s845_s14 = smov 1   ;;  %s53_s16 = sshll.u32 %s994_s4, 4  ;;  %s54_s16 = int_to_ptr.hbm [resolvable:$true] %s53_s16 }
   0xa   :  { %33 = dma.hbm_to_vmem [thread:$0]  %s26_s8, 320, %s28_s12, [#allocation4], %s844_s13, %s844_s13, %s845_s14  }
   0xb   :  { %s846_s17 = smov [#allocation8]   ;;  %s67_s20 = sshll.u32 %s995_s5, 4  ;;  %s68_s20 = int_to_ptr.hbm [resolvable:$true] %s67_s20 }
   0xc   :  { %s55_s1 = sshll.u32 %s846_s17, 4  ;;  %s847_s21 = smov [#allocation9]   ;;  %s56_s1 = int_to_ptr.vmem [resolvable:$true] %s55_s1 }
   0xd   :  { %61 = dma.hbm_to_vmem [thread:$0]  %s54_s16, 6144, %s56_s1, [#allocation7], %s841_s9, %s841_s9, %s842_s10  }
   0xe   :  { %s69_s22 = sshll.u32 %s847_s21, 4  ;;  %s70_s22 = int_to_ptr.vmem [resolvable:$true] %s69_s22 }
   0xf   :  { %72 = dma.hbm_to_vmem [thread:$0]  %s68_s20, 192, %s70_s22, [#allocation10]  }
  0x10   :  { %830 = dma.done.wait [#allocation4], 320  }
  0x11   :  { %831 = vsyncadd [#allocation4], 4294966976 }
  0x12   :  { %832 = dma.done.wait [#allocation7], 11520  }
  0x13   :  { %833 = vsyncadd [#allocation7], 4294955776 }
  0x14   :  { %834 = dma.done.wait [#allocation10], 192  }
  0x15   :  { %835 = vsyncadd [#allocation10], 4294967104  ;;  %vm162_vm0 = vcmask 1041408   ;;  %v665_v0 = vld [vmem:[%s992_s2 + $0x1] ss:$0 sm:$0xff]  ;;  %v132_v3 = vld [vmem:[#allocation6 + $0xf0] sm:$0xff] }
  0x16   :  { %v138_v1 = vld [vmem:[#allocation6 + $0x120] sm:$0x3]  ;;  %v139_v2 = vld [vmem:[#allocation6 + $0x128] sm:$0x3]  ;;  %v133_v4 = vld [vmem:[#allocation6 + $0xf8] sm:$0xff]  ;;  %s848_s5 = smov 32  }
  0x17   :  { %632 = vmatpush.msk.msra.mxu0 %vm162_vm0, %v138_v1  ;;  %97 = vrot.lane.b32.xlu0 %v665_v0, %s848_s5  ;;  %v126_v5 = vld [vmem:[#allocation6 + $0xc0] sm:$0xff]  ;;  %v127_v6 = vld [vmem:[#allocation6 + $0xc8] sm:$0xff]  ;;  %v140_v7 = vld [vmem:[#allocation6 + $0x130] sm:$0x3]  ;;  %s90_s26 = scalar_lea.vmem [#allocation3], %s990_s0  ;;  %vm158_vm1 = vcmask 408576  }
  0x18   :  { %634 = vmatpush.msk.msra.mxu1 %vm162_vm0, %v139_v2  ;;  %v141_v8 = vld [vmem:[#allocation6 + $0x138] sm:$0x3]  ;;  %v120_v9 = vld [vmem:[#allocation6 + $0x90] sm:$0xff]  ;;  %636 = vmatpush.msk.msra.mxu2 %vm162_vm0, %v140_v7  ;;  %v134_v10 = vld [vmem:[#allocation6 + $0x100] sm:$0xff]  ;;  %vm100_vm2 = vcmask 261120   ;;  %vm364_vm3 = vcmask 523264  }
  0x19   :  { %191 = vmatpush.msra.mxu0 %v132_v3  ;;  %v121_v11 = vld [vmem:[#allocation6 + $0x98] sm:$0xff]  ;;  %638 = vmatpush.msk.msra.mxu3 %vm162_vm0, %v141_v8  ;;  %v135_v12 = vld [vmem:[#allocation6 + $0x108] sm:$0xff]  ;;  %v114_v13 = vld [vmem:[#allocation6 + $0x60] sm:$0xff]  ;;  %s849_s30 = smov [#allocation12]   ;;  %s610_s11 = sshll.u32 %s997_s7, 4  ;;  %s611_s11 = int_to_ptr.hbm [resolvable:$true] %s610_s11 }
  0x1a   :  { %211 = vmatpush.msra.mxu1 %v133_v4  ;;  %231 = vmatpush.msra.mxu2 %v134_v10  ;;  %v128_v14 = vld [vmem:[#allocation6 + $0xd0] sm:$0xff]  ;;  %v129_v15 = vld [vmem:[#allocation6 + $0xd8] sm:$0xff]  ;;  %v115_v16 = vld [vmem:[#allocation6 + $0x68] sm:$0xff]  ;;  %s608_s8 = sshll.u32 %s849_s30, 4  ;;  %s600_s15 = sshll.u32 %s996_s6, 4  ;;  %s609_s8 = int_to_ptr.vmem [resolvable:$true] %s608_s8  ;;  %s601_s15 = int_to_ptr.hbm [resolvable:$true] %s600_s15 }
  0x1b   :  { %192 = vmatpush.msra.mxu0 %v126_v5  ;;  %251 = vmatpush.msra.mxu3 %v135_v12  ;;  %v122_v17 = vld [vmem:[#allocation6 + $0xa0] sm:$0xff]  ;;  %v108_v18 = vld [vmem:[#allocation6 + $0x30] sm:$0xff]  ;;  %v123_v19 = vld [vmem:[#allocation6 + $0xa8] sm:$0xff] }
  0x1c   :  { %212 = vmatpush.msra.mxu1 %v127_v6  ;;  %232 = vmatpush.msra.mxu2 %v128_v14  ;;  %v109_v20 = vld [vmem:[#allocation6 + $0x38] sm:$0xff]  ;;  %v116_v21 = vld [vmem:[#allocation6 + $0x70] sm:$0xff]  ;;  %v102_v22 = vld [vmem:[#allocation6] sm:$0xff] }
  0x1d   :  { %193 = vmatpush.msra.mxu0 %v120_v9  ;;  %252 = vmatpush.msra.mxu3 %v129_v15  ;;  %v117_v23 = vld [vmem:[#allocation6 + $0x78] sm:$0xff]  ;;  %v103_v24 = vld [vmem:[#allocation6 + $0x8] sm:$0xff]  ;;  %v142_v25 = vld [vmem:[#allocation6 + $0x140] sm:$0x3] }
  0x1e   :  { %213 = vmatpush.msra.mxu1 %v121_v11  ;;  %233 = vmatpush.msra.mxu2 %v122_v17  ;;  %v143_v26 = vld [vmem:[#allocation6 + $0x148] sm:$0x3]  ;;  %v110_v27 = vld [vmem:[#allocation6 + $0x40] sm:$0xff]  ;;  %v136_v28 = vld [vmem:[#allocation6 + $0x110] sm:$0xff] }
  0x1f   :  { %194 = vmatpush.msra.mxu0 %v114_v13  ;;  %253 = vmatpush.msra.mxu3 %v123_v19  ;;  %v111_v29 = vld [vmem:[#allocation6 + $0x48] sm:$0xff]  ;;  %v137_v30 = vld [vmem:[#allocation6 + $0x118] sm:$0xff]  ;;  %v104_v31 = vld [vmem:[#allocation6 + $0x10] sm:$0xff] }
  0x20   :  { %214 = vmatpush.msra.mxu1 %v115_v16  ;;  %234 = vmatpush.msra.mxu2 %v116_v21  ;;  %v130_v32 = vld [vmem:[#allocation6 + $0xe0] sm:$0xff]  ;;  %v105_v33 = vld [vmem:[#allocation6 + $0x18] sm:$0xff]  ;;  %v131_v34 = vld [vmem:[#allocation6 + $0xe8] sm:$0xff] }
  0x21   :  { %195 = vmatpush.msra.mxu0 %v108_v18  ;;  %254 = vmatpush.msra.mxu3 %v117_v23  ;;  %v343_v35 = vld [vmem:[#allocation8 + $0x150] sm:$0xff]  ;;  %v124_v36 = vld [vmem:[#allocation6 + $0xb0] sm:$0xff]  ;;  %v344_v37 = vld [vmem:[#allocation8 + $0x158] sm:$0xff] }
  0x22   :  { %215 = vmatpush.msra.mxu1 %v109_v20  ;;  %235 = vmatpush.msra.mxu2 %v110_v27  ;;  %v125_v38 = vld [vmem:[#allocation6 + $0xb8] sm:$0xff]  ;;  %v337_v39 = vld [vmem:[#allocation8 + $0x120] sm:$0xff]  ;;  %v118_v40 = vld [vmem:[#allocation6 + $0x80] sm:$0xff] }
  0x23   :  { %196 = vmatpush.msra.mxu0 %v102_v22  ;;  %255 = vmatpush.msra.mxu3 %v111_v29  ;;  %v338_v41 = vld [vmem:[#allocation8 + $0x128] sm:$0xff]  ;;  %v119_v42 = vld [vmem:[#allocation6 + $0x88] sm:$0xff]  ;;  %v331_v43 = vld [vmem:[#allocation8 + $0xf0] sm:$0xff] }
  0x24   :  { %216 = vmatpush.msra.mxu1 %v103_v24  ;;  %236 = vmatpush.msra.mxu2 %v104_v31  ;;  %v112_v44 = vld [vmem:[#allocation6 + $0x50] sm:$0xff]  ;;  %v332_v45 = vld [vmem:[#allocation8 + $0xf8] sm:$0xff]  ;;  %v113_v46 = vld [vmem:[#allocation6 + $0x58] sm:$0xff] }
  0x25   :  { %640 = vmatpush.msk.msrb.mxu0 %vm162_vm0, %v142_v25  ;;  %256 = vmatpush.msra.mxu3 %v105_v33  ;;  %v91_v47 = vld [vmem:[%s90_s26] sm:$0x1]  ;;  %v106_v48 = vld [vmem:[#allocation6 + $0x20] sm:$0xff]  ;;  %v325_v50 = vld [vmem:[#allocation8 + $0xc0] sm:$0xff] }
  0x26   :  { %642 = vmatpush.msk.msrb.mxu1 %vm162_vm0, %v143_v26  ;;  %376 = vmatpush.msrb.mxu2 %v343_v35  ;;  %v107_v49 = vld [vmem:[#allocation6 + $0x28] sm:$0xff]  ;;  %v326_v51 = vld [vmem:[#allocation8 + $0xc8] sm:$0xff]  ;;  %v345_v52 = vld [vmem:[#allocation8 + $0x160] sm:$0xff] }
  0x27   :  { %271 = vmatpush.msrb.mxu0 %v136_v28  ;;  %396 = vmatpush.msrb.mxu3 %v344_v37  ;;  %v346_v53 = vld [vmem:[#allocation8 + $0x168] sm:$0xff]  ;;  %v319_v54 = vld [vmem:[#allocation8 + $0x90] sm:$0xff]  ;;  %v320_v55 = vld [vmem:[#allocation8 + $0x98] sm:$0xff] }
  0x28   :  { %291 = vmatpush.msrb.mxu1 %v137_v30  ;;  %377 = vmatpush.msrb.mxu2 %v337_v39  ;;  %v339_v56 = vld [vmem:[#allocation8 + $0x130] sm:$0xff]  ;;  %v340_v57 = vld [vmem:[#allocation8 + $0x138] sm:$0xff]  ;;  %v313_v58 = vld [vmem:[#allocation8 + $0x60] sm:$0xff] }
  0x29   :  { %272 = vmatpush.msrb.mxu0 %v130_v32  ;;  %397 = vmatpush.msrb.mxu3 %v338_v41  ;;  %v314_v59 = vld [vmem:[#allocation8 + $0x68] sm:$0xff]  ;;  %v333_v60 = vld [vmem:[#allocation8 + $0x100] sm:$0xff]  ;;  %v307_v62 = vld [vmem:[#allocation8 + $0x30] sm:$0xff] }
  0x2a   :  { %292 = vmatpush.msrb.mxu1 %v131_v34  ;;  %378 = vmatpush.msrb.mxu2 %v331_v43  ;;  %v334_v61 = vld [vmem:[#allocation8 + $0x108] sm:$0xff]  ;;  %v308_v63 = vld [vmem:[#allocation8 + $0x38] sm:$0xff]  ;;  %v327_v0 = vld [vmem:[#allocation8 + $0xd0] sm:$0xff] }
  0x2b   :  { %273 = vmatpush.msrb.mxu0 %v124_v36  ;;  %398 = vmatpush.msrb.mxu3 %v332_v45  ;;  %v328_v1 = vld [vmem:[#allocation8 + $0xd8] sm:$0xff]  ;;  %v301_v2 = vld [vmem:[#allocation8] sm:$0xff]  ;;  %v302_v3 = vld [vmem:[#allocation8 + $0x8] sm:$0xff] }
  0x2c   :  { %293 = vmatpush.msrb.mxu1 %v125_v38  ;;  %633 = vmatmul.msk.f32.vlgmr.msra.gmra.mxu0 %vm158_vm1, %v91_v47  ;;  %v321_v4 = vld [vmem:[#allocation8 + $0xa0] sm:$0xff]  ;;  %v322_v5 = vld [vmem:[#allocation8 + $0xa8] sm:$0xff]  ;;  %v347_v6 = vld [vmem:[#allocation8 + $0x170] sm:$0xff] }
  0x2d   :  { %274 = vmatpush.msrb.mxu0 %v118_v40  ;;  %635 = vmatmul.msk.f32.vlgmr.msra.gmra.mxu1 %vm158_vm1, %v91_v47  ;;  %v348_v7 = vld [vmem:[#allocation8 + $0x178] sm:$0xff]  ;;  %v315_v8 = vld [vmem:[#allocation8 + $0x70] sm:$0xff]  ;;  %v341_v10 = vld [vmem:[#allocation8 + $0x140] sm:$0xff] }
  0x2e   :  { %294 = vmatpush.msrb.mxu1 %v119_v42  ;;  %379 = vmatpush.msrb.mxu2 %v325_v50  ;;  %v316_v9 = vld [vmem:[#allocation8 + $0x78] sm:$0xff]  ;;  %v342_v11 = vld [vmem:[#allocation8 + $0x148] sm:$0xff]  ;;  %v309_v12 = vld [vmem:[#allocation8 + $0x40] sm:$0xff] }
  0x2f   :  { %275 = vmatpush.msrb.mxu0 %v112_v44  ;;  %399 = vmatpush.msrb.mxu3 %v326_v51  ;;  %v310_v13 = vld [vmem:[#allocation8 + $0x48] sm:$0xff]  ;;  %v335_v14 = vld [vmem:[#allocation8 + $0x110] sm:$0xff]  ;;  %v336_v15 = vld [vmem:[#allocation8 + $0x118] sm:$0xff] }
  0x30   :  { %295 = vmatpush.msrb.mxu1 %v113_v46  ;;  %380 = vmatpush.msrb.mxu2 %v319_v54  ;;  %v303_v16 = vld [vmem:[#allocation8 + $0x10] sm:$0xff]  ;;  %v304_v17 = vld [vmem:[#allocation8 + $0x18] sm:$0xff]  ;;  %v329_v18 = vld [vmem:[#allocation8 + $0xe0] sm:$0xff] }
  0x31   :  { %276 = vmatpush.msrb.mxu0 %v106_v48  ;;  %400 = vmatpush.msrb.mxu3 %v320_v55  ;;  %v330_v19 = vld [vmem:[#allocation8 + $0xe8] sm:$0xff]  ;;  %v323_v20 = vld [vmem:[#allocation8 + $0xb0] sm:$0xff]  ;;  %v324_v21 = vld [vmem:[#allocation8 + $0xb8] sm:$0xff] }
  0x32   :  { %296 = vmatpush.msrb.mxu1 %v107_v49  ;;  %381 = vmatpush.msrb.mxu2 %v313_v58  ;;  %v317_v22 = vld [vmem:[#allocation8 + $0x80] sm:$0xff]  ;;  %v318_v23 = vld [vmem:[#allocation8 + $0x88] sm:$0xff]  ;;  %v311_v24 = vld [vmem:[#allocation8 + $0x50] sm:$0xff] }
  0x33   :  { %416 = vmatpush.msra.mxu0 %v345_v52  ;;  %401 = vmatpush.msrb.mxu3 %v314_v59  ;;  %v312_v25 = vld [vmem:[#allocation8 + $0x58] sm:$0xff]  ;;  %v305_v26 = vld [vmem:[#allocation8 + $0x20] sm:$0xff]  ;;  %v306_v27 = vld [vmem:[#allocation8 + $0x28] sm:$0xff] }
  0x34   :  { %436 = vmatpush.msra.mxu1 %v346_v53  ;;  %382 = vmatpush.msrb.mxu2 %v307_v62  ;;  %v928_v28 = vld [vmem:[%s992_s2] sm:$0x1]  ;;  %v934_v33 = vld [vmem:[#allocation9] ss:$2 sm:$0x3f] }
  0x35   :  { %417 = vmatpush.msra.mxu0 %v339_v56  ;;  %402 = vmatpush.msrb.mxu3 %v308_v63  ;;  %v936_v34 = vld [vmem:[#allocation9 + $0x1] ss:$2 sm:$0x3f]  ;;  %v149_v36 = vperm.slane %v934_v33, 3  ;;  %v146_v40 = vperm.slane %v934_v33, 0  ;;  %v147_v44 = vperm.slane %v934_v33, 1 }
  0x36   :  { %437 = vmatpush.msra.mxu1 %v340_v57  ;;  %637 = vmatmul.msk.f32.vlgmr.msra.gmra.mxu2 %vm158_vm1, %v91_v47  ;;  %v355_v38 = vperm.slane %v936_v34, 3  ;;  %v352_v45 = vperm.slane %v936_v34, 0  ;;  %v353_v46 = vperm.slane %v936_v34, 1  ;;  %v150_v55 = vperm.slane %v934_v33, 4 }
  0x37   :  { %418 = vmatpush.msra.mxu0 %v333_v60  ;;  %639 = vmatmul.msk.f32.vlgmr.msra.gmra.mxu3 %vm158_vm1, %v91_v47  ;;  %v356_v60 = vperm.slane %v936_v34, 4 }
  0x38   :  { %438 = vmatpush.msra.mxu1 %v334_v61  ;;  %641 = vmatmul.msk.f32.vlgmr.msrb.gmra.mxu0 %vm158_vm1, %v91_v47 }
  0x39   :  { %419 = vmatpush.msra.mxu0 %v327_v0  ;;  %643 = vmatmul.msk.f32.vlgmr.msrb.gmra.mxu1 %vm158_vm1, %v91_v47 }
  0x3a   :  { %439 = vmatpush.msra.mxu1 %v328_v1  ;;  %383 = vmatpush.msrb.mxu2 %v301_v2 }
  0x3b   :  { %403 = vmatpush.msrb.mxu3 %v302_v3  ;;  %420 = vmatpush.msra.mxu0 %v321_v4 }
  0x3c   :  { %440 = vmatpush.msra.mxu1 %v322_v5  ;;  %456 = vmatpush.msra.mxu2 %v347_v6 }
  0x3d   :  { %476 = vmatpush.msra.mxu3 %v348_v7  ;;  %421 = vmatpush.msra.mxu0 %v315_v8 }
  0x3e   :  { %441 = vmatpush.msra.mxu1 %v316_v9  ;;  %457 = vmatpush.msra.mxu2 %v341_v10 }
  0x3f   :  { %477 = vmatpush.msra.mxu3 %v342_v11  ;;  %422 = vmatpush.msra.mxu0 %v309_v12 }
  0x40   :  { %442 = vmatpush.msra.mxu1 %v310_v13  ;;  %458 = vmatpush.msra.mxu2 %v335_v14  ;;  %v357_v13 = vperm.slane %v936_v34, 5 }
  0x41   :  { %478 = vmatpush.msra.mxu3 %v336_v15  ;;  %423 = vmatpush.msra.mxu0 %v303_v16 }
  0x42   :  { %443 = vmatpush.msra.mxu1 %v304_v17  ;;  %459 = vmatpush.msra.mxu2 %v329_v18 }
  0x43   :  { %479 = vmatpush.msra.mxu3 %v330_v19 }
  0x44   :  { %460 = vmatpush.msra.mxu2 %v323_v20 }
  0x45   :  { %480 = vmatpush.msra.mxu3 %v324_v21  ;;  %v151_v21 = vperm.slane %v934_v33, 5 }
  0x46   :  { %461 = vmatpush.msra.mxu2 %v317_v22 }
  0x47   :  { %481 = vmatpush.msra.mxu3 %v318_v23 }
  0x48   :  { %462 = vmatpush.msra.mxu2 %v311_v24 }
  0x49   :  { %482 = vmatpush.msra.mxu3 %v312_v25  ;;  %v354_v25 = vperm.slane %v936_v34, 2 }
  0x4a   :  { %463 = vmatpush.msra.mxu2 %v305_v26 }
  0x4b   :  { %483 = vmatpush.msra.mxu3 %v306_v27 }
  0x89   :  { %v98_v29 = vpop.permute.xlu0 %97 }
  0x8a   :  { %v101_v30 = vsel %vm100_vm2, %v928_v28, %v98_v29 }
  0x8b   :  { %644 = vmatmul.msk.f32.vlgmr.msrb.gmra.mxu2 %vm364_vm3, %v101_v30  ;;  %645 = vmatmul.msk.f32.vlgmr.msrb.gmra.mxu3 %vm364_vm3, %v101_v30 }
  0x8c   :  { %646 = vmatmul.msk.f32.vlgmr.msra.gmra.mxu0 %vm364_vm3, %v101_v30  ;;  %647 = vmatmul.msk.f32.vlgmr.msra.gmra.mxu1 %vm364_vm3, %v101_v30 }
  0x93   :  { %648 = vmatmul.msk.f32.vlgmr.msra.gmra.mxu2 %vm364_vm3, %v101_v30  ;;  %649 = vmatmul.msk.f32.vlgmr.msra.gmra.mxu3 %vm364_vm3, %v101_v30 }
  0xa9   :  { %v198_v42 = vpop.f32.mrf.mxu0 }
  0xaa   :  { %v218_v31 = vpop.f32.mrf.mxu1  ;;  %v199_v48 = vadd.f32 %v198_v42, %v146_v40 }
  0xab   :  { %v219_v52 = vadd.f32 %v218_v31, %v147_v44 }
  0xb5   :  { %v278_v61 = vpop.f32.mrf.mxu0 }
  0xb6   :  { %v932_v32 = vpop.f32.mrf.mxu1  ;;  %v279_v62 = vadd.f32 %v278_v61, %v150_v55 }
  0xb9   :  { %v938_v35 = vpop.f32.mrf.mxu2 }
  0xba   :  { %v258_v37 = vpop.f32.mrf.mxu3 }
  0xbb   :  { %v259_v39 = vadd.f32 %v258_v37, %v149_v36 }
 0x109   :  { %v445_v41 = vpop.f32.mrf.mxu1  ;;  %v425_v40 = vpop.f32.mrf.mxu0 }
 0x10a   :  { %v446_v43 = vadd.f32 %v445_v41, %v355_v38 }
 0x10c   :  { %v537_v47 = vadd.f32 %v446_v43, %v259_v39  ;;  %v148_v43 = vperm.slane %v934_v33, 2 }
 0x10e   :  { %v652_v49 = vmul.f32 -1.442695, %v537_v47  ;;  %v385_v50 = vpop.f32.mrf.mxu2  ;;  %v405_v51 = vpop.f32.mrf.mxu3  ;;  %v426_v47 = vadd.f32 %v425_v40, %v354_v25  ;;  %v239_v33 = vadd.f32 %v938_v35, %v148_v43 }
 0x10f   :  { %v386_v53 = vadd.f32 %v385_v50, %v352_v45  ;;  %v406_v54 = vadd.f32 %v405_v51, %v353_v46  ;;  %v299_v45 = vadd.f32 %v932_v32, %v151_v21 }
 0x110   :  { %666 = vpow2.f32 %v652_v49 }
 0x111   :  { %v488_v56 = vadd.f32 %v386_v53, %v199_v48  ;;  %v508_v57 = vadd.f32 %v406_v54, %v219_v52 }
 0x113   :  { %v650_v58 = vmul.f32 -1.442695, %v488_v56  ;;  %v651_v59 = vmul.f32 -1.442695, %v508_v57 }
 0x115   :  { %668 = vpow2.f32 %v650_v58 }
 0x116   :  { %v667_v63 = vpop.eup %666  ;;  %670 = vpow2.f32 %v651_v59  ;;  %v465_v0 = vpop.f32.mrf.mxu2 }
 0x117   :  { %v541_v1 = vadd.f32 1.0, %v667_v63  ;;  %v466_v2 = vadd.f32 %v465_v0, %v356_v60  ;;  %v485_v17 = vpop.f32.mrf.mxu3 }
 0x118   :  { %v486_v27 = vadd.f32 %v485_v17, %v357_v13 }
 0x119   :  { %672 = vrcp.f32 %v541_v1  ;;  %v557_v3 = vadd.f32 %v466_v2, %v279_v62  ;;  %v553_v14 = vand.u32 2147483648, %v541_v1  ;;  %v551_v19 = vand.u32 2147483647, %v541_v1 }
 0x11a   :  { %vm547_vm5 = vweird.f32 %v541_v1 }
 0x11b   :  { %v669_v4 = vpop.eup %668  ;;  %v653_v5 = vmul.f32 -1.442695, %v557_v3  ;;  %v554_v29 = vor.u32 1.1754944e-38, %v553_v14  ;;  %vm552_vm7 = vcmp.eq.f32.partialorder %v551_v19, 8.507059e+37 }
 0x11c   :  { %v671_v6 = vpop.eup %670  ;;  %v492_v7 = vadd.f32 1.0, %v669_v4 }
 0x11d   :  { %v948_v8 = vadd.f32 1.0, %v671_v6  ;;  %674 = vpow2.f32 %v653_v5 }
 0x11e   :  { %676 = vrcp.f32 %v492_v7  ;;  %v504_v30 = vand.u32 2147483648, %v492_v7  ;;  %v502_v38 = vand.u32 2147483647, %v492_v7  ;;  %vm498_vm9 = vweird.f32 %v492_v7 }
 0x11f   :  { %v673_v9 = vpop.eup %672  ;;  %678 = vrcp.f32 %v948_v8  ;;  %v524_v54 = vand.u32 2147483648, %v948_v8  ;;  %vm518_vm13 = vweird.f32 %v948_v8  ;;  %v522_v56 = vand.u32 2147483647, %v948_v8 }
 0x120   :  { %v543_v10 = vmul.f32 %v673_v9, %v541_v1  ;;  %vm548_vm4 = vweird.f32 %v673_v9  ;;  %v505_v46 = vor.u32 1.1754944e-38, %v504_v30  ;;  %vm503_vm11 = vcmp.eq.f32.partialorder %v502_v38, 8.507059e+37  ;;  %v631_v1 = vld [vmem:[%s992_s2 + $0x1] sm:$0x1]  ;;  %s850_s2 = smov [#allocation11]  }
 0x121   :  { %vm549_vm6 = vmor %vm547_vm5, %vm548_vm4  ;;  %v525_v61 = vor.u32 1.1754944e-38, %v524_v54  ;;  %vm523_vm3 = vcmp.eq.f32.partialorder %v522_v56, 8.507059e+37  ;;  %vm535_vm5 = vcmask 253952   ;;  %s598_s12 = sshll.u32 %s850_s2, 4  ;;  %s599_s12 = int_to_ptr.vmem [resolvable:$true] %s598_s12 }
 0x122   :  { %v544_v11 = vsub.f32 1.0, %v543_v10 }
 0x123   :  { %v675_v12 = vpop.eup %674 }
 0x124   :  { %v677_v15 = vpop.eup %676  ;;  %v952_v16 = vadd.f32 1.0, %v675_v12  ;;  %v545_v18 = vmul.f32 %v673_v9, %v544_v11 }
 0x125   :  { %v954_v20 = vpop.eup %678  ;;  %v494_v22 = vmul.f32 %v677_v15, %v492_v7  ;;  %vm499_vm8 = vweird.f32 %v677_v15 }
 0x126   :  { %v514_v23 = vmul.f32 %v954_v20, %v948_v8  ;;  %680 = vrcp.f32 %v952_v16  ;;  %v546_v24 = vadd.f32 %v673_v9, %v545_v18  ;;  %vm500_vm10 = vmor %vm498_vm9, %vm499_vm8  ;;  %vm519_vm12 = vweird.f32 %v954_v20 }
 0x127   :  { %v495_v26 = vsub.f32 1.0, %v494_v22  ;;  %v573_v32 = vand.u32 2147483648, %v952_v16  ;;  %v571_v58 = vand.u32 2147483647, %v952_v16  ;;  %vm520_vm15 = vmor %vm518_vm13, %vm519_vm12  ;;  %vm567_vm0 = vweird.f32 %v952_v16 }
 0x128   :  { %v515_v31 = vsub.f32 1.0, %v514_v23  ;;  %v550_v36 = vsel %vm549_vm6, %v673_v9, %v546_v24  ;;  %vm591_vm6 = vcmask 516096  }
 0x129   :  { %v496_v37 = vmul.f32 %v677_v15, %v495_v26  ;;  %v555_v39 = vsel %vm552_vm7, %v554_v29, %v550_v36  ;;  %v574_v62 = vor.u32 1.1754944e-38, %v573_v32  ;;  %vm572_vm4 = vcmp.eq.f32.partialorder %v571_v58, 8.507059e+37 }
 0x12a   :  { %v577_v41 = vmul.f32 %v555_v39, %v486_v27  ;;  %v516_v42 = vmul.f32 %v954_v20, %v515_v31 }
 0x12b   :  { %v497_v44 = vadd.f32 %v677_v15, %v496_v37 }
 0x12c   :  { %v681_v34 = vpop.eup %680  ;;  %v578_v50 = vadd.f32 %v577_v41, %v299_v45  ;;  %v517_v51 = vadd.f32 %v954_v20, %v516_v42 }
 0x12d   :  { %v563_v48 = vmul.f32 %v681_v34, %v952_v16  ;;  %v501_v49 = vsel %vm500_vm10, %v677_v15, %v497_v44  ;;  %vm568_vm14 = vweird.f32 %v681_v34 }
 0x12e   :  { %v506_v52 = vsel %vm503_vm11, %v505_v46, %v501_v49  ;;  %682 = vtanh.f32 %v578_v50  ;;  %v521_v60 = vsel %vm520_vm15, %v954_v20, %v517_v51  ;;  %vm569_vm1 = vmor %vm567_vm0, %vm568_vm14 }
 0x12f   :  { %v564_v53 = vsub.f32 1.0, %v563_v48  ;;  %v528_v55 = vmul.f32 %v506_v52, %v426_v47  ;;  %v526_v0 = vsel %vm523_vm3, %v525_v61, %v521_v60 }
 0x130   :  { %v531_v5 = vsub.f32 1.0, %v526_v0  ;;  %v533_v9 = vmul.f32 %v526_v0, %v928_v28 }
 0x131   :  { %v565_v57 = vmul.f32 %v681_v34, %v564_v53  ;;  %v529_v59 = vadd.f32 %v528_v55, %v239_v33 }
 0x133   :  { %v566_v35 = vadd.f32 %v681_v34, %v565_v57  ;;  %684 = vtanh.f32 %v529_v59 }
 0x134   :  { %v683_v4 = vpop.eup %682 }
 0x135   :  { %v570_v63 = vsel %vm569_vm1, %v681_v34, %v566_v35 }
 0x136   :  { %v575_v2 = vsel %vm572_vm4, %v574_v62, %v570_v63 }
 0x137   :  { %v580_v3 = vsub.f32 1.0, %v575_v2  ;;  %v582_v8 = vmul.f32 %v631_v1, %v575_v2 }
 0x139   :  { %v685_v6 = vpop.eup %684  ;;  %v581_v7 = vmul.f32 %v683_v4, %v580_v3 }
 0x13a   :  { %v532_v10 = vmul.f32 %v685_v6, %v531_v5 }
 0x13b   :  { %v583_v11 = vadd.f32 %v582_v8, %v581_v7 }
 0x13c   :  { %v534_v12 = vadd.f32 %v533_v9, %v532_v10 }
 0x13d   :  { %587 = vrot.lane.b32.xlu0 %v583_v11, %s848_s5  ;;  %585 = vst.msk [vmem:[#allocation12 + $0x1] sm:$0x1] %vm535_vm5, %v583_v11 }
 0x13e   :  { %536 = vst.msk [vmem:[#allocation12] sm:$0x1] %vm535_vm5, %v534_v12 }
 0x13f   :  { %616 = dma.vmem_to_hbm [thread:$0]  %s609_s8, 32, %s611_s11, [#allocation13], %s844_s13, %s844_s13, %s845_s14  }
 0x1af   :  { %v588_v28 = vpop.permute.xlu0 %587 }
 0x1b0   :  { %v590_v13 = vsel %vm100_vm2, %v534_v12, %v588_v28 }
 0x1b1   :  { %592 = vst.msk [vmem:[#allocation11] sm:$0x1] %vm591_vm6, %v590_v13 }
 0x1b2   :  { %603 = dma.vmem_to_hbm [thread:$0]  %s599_s12, 16, %s601_s15, [#allocation5]  }
 0x1b3   :  { %836 = dma.done.wait [#allocation5], 16  }
 0x1b4   :  { %837 = vsyncadd [#allocation5], 4294967280 }
 0x1b5   :  { %838 = dma.done.wait [#allocation13], 32  }
 0x1b6   :  { %839 = vsyncadd [#allocation13], 4294967264 }
 0x1b7   :  { %625 = vsyncpa [#allocation4], 1 }
 0x1b8   :  { %626 = vsyncpa [#allocation7], 1 }
 0x1b9   :  { %627 = vsyncpa [#allocation10], 1 }
 0x1ba   :  { %628 = vsyncpa [#allocation5], 1 }
 0x1bb   :  { %629 = vsyncpa [#allocation13], 1 }

</bundles_post_ra>
